<compile_context>
chip_gen: v5e
topology: v5e:2x2
jax: 0.10.0
libtpu: 0.0.40
codegen_flags: <defaults>
</compile_context>

<pallas_src>
import functools

import jax
import jax.numpy as jnp
from jax import lax
from jax.experimental import pallas as pl
from jax.experimental.pallas import tpu as pltpu


def _round_up(x, m):
    return (x + m - 1) // m * m


def _layernorm_kernel(x_ref, gamma_ref, beta_ref, o_ref, *,
                      eps, n_features, chunk_rows, num_chunks):
    # x_ref/o_ref: (block_rows, H); gamma/beta: (1, H).
    gamma = gamma_ref[...].astype(jnp.float32)
    beta = beta_ref[...].astype(jnp.float32)

    inv_n = jnp.float32(1.0 / n_features)
    inv_nm1 = jnp.float32(1.0 / max(n_features - 1, 1))
    eps_f = jnp.float32(eps)

    def process(r0):
        # Bounded f32 working set: only this chunk is materialized in f32.
        x = x_ref[pl.ds(r0, chunk_rows), :].astype(jnp.float32)
        mean = jnp.sum(x, axis=-1, keepdims=True) * inv_n
        xc = x - mean
        # Unbiased variance (N-1) to match torch.std() default.
        var = jnp.sum(xc * xc, axis=-1, keepdims=True) * inv_nm1
        std = jnp.sqrt(var)
        inv = pl.reciprocal(std + eps_f, approx=False)   # exact; per-row only
        y = gamma * (xc * inv) + beta
        o_ref[pl.ds(r0, chunk_rows), :] = y.astype(o_ref.dtype)

    if num_chunks == 1:
        process(0)
    else:
        def body(c, carry):
            process(pl.multiple_of(c * chunk_rows, chunk_rows))
            return carry
        lax.fori_loop(0, num_chunks, body, 0, unroll=True)


def layer_norm(x, gamma, beta, *, eps=1e-6, block_rows=None):
    """LayerNorm over the last axis of `x`.

    x:     (..., H)
    gamma: (H,)   scale (a_2)
    beta:  (H,)   shift (b_2)
    """
    orig_shape = x.shape
    H = orig_shape[-1]
    R = 1
    for d in orig_shape[:-1]:
        R *= d

    dtype_bytes = jnp.dtype(x.dtype).itemsize
    io_row_bytes = H * dtype_bytes
    f32_row_bytes = H * 4

    # In-kernel row sub-chunk: keep each f32 temporary (chunk_rows, H) <= ~1 MiB.
    chunk_rows = max(8, min(512, ((1 << 20) // f32_row_bytes) // 8 * 8))

    if block_rows is None:
        # ~4 MiB I/O tiles: near HBM roofline, modest per-step overhead.
        target_block_bytes = 4 * 1024 * 1024
        block_rows = max(chunk_rows,
                         (target_block_bytes // io_row_bytes)
                         // chunk_rows * chunk_rows)
        # Keep >= ~8 grid steps when R allows (v7x: >= ~4 steps per core),
        # and never tile wider than the (8-row rounded) problem itself.
        steps_cap = _round_up(max(pl.cdiv(R, 8), 1), 8)
        block_rows = min(block_rows, steps_cap, _round_up(R, 8))

    block_rows = max(8, (block_rows // 8) * 8)
    chunk_rows = min(chunk_rows, block_rows)
    block_rows = max(chunk_rows, (block_rows // chunk_rows) * chunk_rows)
    num_chunks = block_rows // chunk_rows

    grid = (pl.cdiv(R, block_rows),)   # ragged final block handled by Pallas

    x2 = x.reshape(R, H)               # free: row-major collapse of leading dims
    g2 = gamma.reshape(1, H)
    b2 = beta.reshape(1, H)
    param_bytes = (jnp.dtype(gamma.dtype).itemsize
                   + jnp.dtype(beta.dtype).itemsize)

    # Explicit scoped-VMEM budget: in+out double-buffered blocks, params,
    # in-kernel f32 chunk temporaries, plus margin for compiler scratch.
    vmem_needed = (4 * block_rows * io_row_bytes
                   + 4 * H * param_bytes
                   + 6 * chunk_rows * f32_row_bytes
                   + (2 << 20))
    vmem_limit = int(min(max(vmem_needed, 32 * 1024 * 1024),
                         56 * 1024 * 1024))

    cost = pl.CostEstimate(
        flops=8 * R * H,
        transcendentals=2 * R,                       # sqrt + reciprocal per row
        bytes_accessed=2 * R * H * dtype_bytes + H * param_bytes,
    )

    out2 = pl.pallas_call(
        functools.partial(_layernorm_kernel, eps=eps, n_features=H,
                          chunk_rows=chunk_rows, num_chunks=num_chunks),
        out_shape=jax.ShapeDtypeStruct((R, H), x.dtype),
        grid_spec=pltpu.PrefetchScalarGridSpec(
            num_scalar_prefetch=0,
            grid=grid,
            in_specs=[
                pl.BlockSpec((block_rows, H), lambda i: (i, 0)),
                pl.BlockSpec((1, H), lambda i: (0, 0)),
                pl.BlockSpec((1, H), lambda i: (0, 0)),
            ],
            out_specs=pl.BlockSpec((block_rows, H), lambda i: (i, 0)),
        ),
        compiler_params=pltpu.CompilerParams(
            dimension_semantics=("parallel",),
            vmem_limit_bytes=vmem_limit,
        ),
        cost_estimate=cost,
    )(x2, g2, b2)

    return out2.reshape(orig_shape)


def _reference(x, gamma, beta, eps=1e-6):
    x32 = x.astype(jnp.float32)
    mean = jnp.mean(x32, axis=-1, keepdims=True)
    var = jnp.sum((x32 - mean) ** 2, axis=-1, keepdims=True) / (x.shape[-1] - 1)
    std = jnp.sqrt(var)
    return (gamma * (x32 - mean) / (std + eps) + beta).astype(x.dtype)


if __name__ == "__main__":
    key = jax.random.PRNGKey(0)

    B, S, H = 2, 8, 32  # batch, seq, hidden (features)
    x = jax.random.normal(key, (B, S, H), dtype=jnp.float32)

    # Deterministic parameter init matching nn.Parameter(ones / zeros).
    gamma = jnp.ones((H,), dtype=jnp.float32)   # a_2
    beta = jnp.zeros((H,), dtype=jnp.float32)   # b_2

    out = layer_norm(x, gamma, beta, eps=1e-6)
    out = jax.block_until_ready(out)

    ref = _reference(x, gamma, beta, eps=1e-6)
    assert out.shape == x.shape
    assert jnp.allclose(out, ref, atol=1e-5, rtol=1e-5)

    print("KERNEL_OK")
</pallas_src>

<mosaic_0001>
module attributes {stable_mosaic.version = 11 : i64} {
  func.func @_layernorm_kernel(%arg0: i32, %arg1: memref<8x32xf32, #tpu.memory_space<vmem>>, %arg2: memref<1x32xf32, #tpu.memory_space<vmem>>, %arg3: memref<1x32xf32, #tpu.memory_space<vmem>>, %arg4: memref<8x32xf32, #tpu.memory_space<vmem>>) attributes {dimension_semantics = [#tpu.dimension_semantics<parallel>], iteration_bounds = array<i64: 2>, scalar_prefetch = 0 : i64, scratch_operands = 0 : i64, tpu.core_type = #tpu.core_type<tc>, window_params = [{transform_indices = @transform_0, window_bounds = array<i64: 8, 32>}, {pipeline_mode = #tpu.pipeline_mode<synchronous>, transform_indices = @transform_1, window_bounds = array<i64: 1, 32>}, {pipeline_mode = #tpu.pipeline_mode<synchronous>, transform_indices = @transform_2, window_bounds = array<i64: 1, 32>}, {transform_indices = @transform_3, window_bounds = array<i64: 8, 32>}]} {
    %c0 = arith.constant 0 : index
    %c0_0 = arith.constant 0 : index
    %0 = vector.load %arg2[%c0, %c0_0] : memref<1x32xf32, #tpu.memory_space<vmem>>, vector<1x32xf32>
    %c0_1 = arith.constant 0 : index
    %c0_2 = arith.constant 0 : index
    %1 = vector.load %arg3[%c0_1, %c0_2] : memref<1x32xf32, #tpu.memory_space<vmem>>, vector<1x32xf32>
    %c0_3 = arith.constant 0 : index
    %c0_4 = arith.constant 0 : index
    %2 = vector.load %arg1[%c0_3, %c0_4] : memref<8x32xf32, #tpu.memory_space<vmem>>, vector<8x32xf32>
    %cst = arith.constant dense<0.000000e+00> : vector<8xf32>
    %3 = vector.multi_reduction <add>, %2, %cst [1] : vector<8x32xf32> to vector<8xf32>
    %4 = vector.shape_cast %3 : vector<8xf32> to vector<8x1xf32>
    %cst_5 = arith.constant 3.125000e-02 : f32
    %5 = vector.broadcast %cst_5 : f32 to vector<8x1xf32>
    %6 = arith.mulf %4, %5 : vector<8x1xf32>
    %7 = vector.broadcast %6 : vector<8x1xf32> to vector<8x32xf32>
    %8 = arith.subf %2, %7 : vector<8x32xf32>
    %9 = arith.mulf %8, %8 : vector<8x32xf32>
    %cst_6 = arith.constant dense<0.000000e+00> : vector<8xf32>
    %10 = vector.multi_reduction <add>, %9, %cst_6 [1] : vector<8x32xf32> to vector<8xf32>
    %11 = vector.shape_cast %10 : vector<8xf32> to vector<8x1xf32>
    %cst_7 = arith.constant 0.0322580636 : f32
    %12 = vector.broadcast %cst_7 : f32 to vector<8x1xf32>
    %13 = arith.mulf %11, %12 : vector<8x1xf32>
    %14 = math.sqrt %13 : vector<8x1xf32>
    %cst_8 = arith.constant 9.99999997E-7 : f32
    %15 = vector.broadcast %cst_8 : f32 to vector<8x1xf32>
    %16 = arith.addf %14, %15 : vector<8x1xf32>
    %17 = tpu.reciprocal %16 : vector<8x1xf32> -> vector<8x1xf32>
    %18 = vector.broadcast %17 : vector<8x1xf32> to vector<8x32xf32>
    %19 = arith.mulf %8, %18 : vector<8x32xf32>
    %20 = vector.broadcast %0 : vector<1x32xf32> to vector<8x32xf32>
    %21 = arith.mulf %20, %19 : vector<8x32xf32>
    %22 = vector.broadcast %1 : vector<1x32xf32> to vector<8x32xf32>
    %23 = arith.addf %21, %22 : vector<8x32xf32>
    %c0_9 = arith.constant 0 : index
    %c0_10 = arith.constant 0 : index
    %24 = vector.load %arg4[%c0_9, %c0_10] : memref<8x32xf32, #tpu.memory_space<vmem>>, vector<8x32xf32>
    tpu.vector_store %arg4[%c0_9, %c0_10], %23 {strides = array<i32>} : memref<8x32xf32, #tpu.memory_space<vmem>>, vector<8x32xf32>,
    return
  }
  func.func @transform_0(%arg0: i32) -> (i32, i32) {
    %c0_i32 = arith.constant 0 : i32
    %c0_i32_0 = arith.constant 0 : i32
    return %arg0, %c0_i32 : i32, i32
  }
  func.func @transform_1(%arg0: i32) -> (i32, i32) {
    %c0_i32 = arith.constant 0 : i32
    %c0_i32_0 = arith.constant 0 : i32
    %c0_i32_1 = arith.constant 0 : i32
    return %c0_i32, %c0_i32_0 : i32, i32
  }
  func.func @transform_2(%arg0: i32) -> (i32, i32) {
    %c0_i32 = arith.constant 0 : i32
    %c0_i32_0 = arith.constant 0 : i32
    %c0_i32_1 = arith.constant 0 : i32
    return %c0_i32, %c0_i32_0 : i32, i32
  }
  func.func @transform_3(%arg0: i32) -> (i32, i32) {
    %c0_i32 = arith.constant 0 : i32
    %c0_i32_0 = arith.constant 0 : i32
    return %arg0, %c0_i32 : i32, i32
  }
}

</mosaic_0001>

<bundles_post_ra>
// kernel: tpu_custom_call.1
= control target key start
LH: loop header
LB: loop body
LE: loop exit
PB: predicated region body
PF: predicated region fallthrough
CT: control target
= control target key end

     0   :  { %8 = vsyncpa [#allocation3], 0  ;;  %s728_s0 = inlined_call_operand.hbm [shape: f32[16,32], index: 0, kind: input, shape index: {}]   ;;  %s729_s1 = inlined_call_operand.hbm [shape: f32[1,32], index: 1, kind: input, shape index: {}]   ;;  %s730_s2 = inlined_call_operand.vmem [shape: f32[1,32], index: 2, kind: input, shape index: {}]   ;;  %s731_s3 = inlined_call_operand.hbm [shape: f32[16,32], index: 3, kind: output, shape index: {}]  }
   0x1   :  { %10 = vsyncpa [#allocation3 + $0x1], 0 }
   0x2   :  { %11 = vsyncpa [#allocation6], 0 }
   0x3   :  { %12 = vsyncpa [#allocation4], 0 }
   0x4   :  { %14 = vsyncpa [#allocation4 + $0x1], 0  ;;  %s580_s12 = smov 0   ;;  %s582_s13 = smov 0  }
   0x5   :  { %s584_s14 = smov 0   ;;  %s586_s15 = smov 0  }
   0x6 LB: > { %s601_s16 = sadd.s32 4294967295, %s557_s15   ;;  %s350_s17 = sadd.s32 4294967294, %s557_s15   ;;  %s557_s15 = sphi %s586_s15, %s741_s15   ;;  %s553_s14 = sphi %s584_s14, %s740_s14   ;;  %s549_s13 = sphi %s582_s13, %s739_s13   ;;  %s545_s12 = sphi %s580_s12, %s738_s12  }
   0x7   : > { %p40_p0 = scmp.ne.s32.totalorder %s549_s13, %s545_s12  ;;  %p41_p1 = scmp.eq.s32.totalorder %s601_s16, 0 }
   0x8   : > { %p106_p2 = scmp.eq.s32.totalorder %s601_s16, 1  ;;  %p112_p3 = scmp.eq.s32.totalorder %s350_s17, 1 }
   0x9   : > { %p610_p4 = por %p41_p1, %p40_p0  ;;  %p351_p5 = scmp.ge.s32.totalorder %s557_s15, 1 }
   0xa   : > { %p615_p6 = por %p112_p3, %p40_p0  ;;  %p119_p7 = scmp.lt.s32.totalorder %s557_s15, 3 }
   0xb   : > { %s131_s22 = sshll.u32 %s729_s1, 4  ;;  %s559_s24 = smov [#allocation5]   ;;  %s132_s22 = int_to_ptr.hbm [resolvable:$true] %s131_s22 }
   0xc   : > { %p623_p8 = pnand %p351_p5, %p119_p7  ;;  %s133_s25 = sshll.u32 %s559_s24, 4  ;;  %s134_s25 = int_to_ptr.vmem [resolvable:$true] %s133_s25 }
   0xd   : > { %s633_s26 = sadd.s32 1, %s557_s15   ;;  %s27_s27 = sadd.s32 1, %s553_s14 }
   0xe   : > { %p372_p10 = pneg %p623_p8  ;;  %s24_s28 = ssub.s32 %s557_s15, %s633_s26 }
   0xf   : > { %p25_p12 = scmp.eq.s32.totalorder %s24_s28, 0  ;;  %p34_p13 = scmp.ne.s32.totalorder %s553_s14, %s549_s13 }
  0x10   : > { %p373_p11 = pnand %p372_p10, %p41_p1  ;;  %p35_p0 = scmp.eq.s32.totalorder %s557_s15, 0 }
  0x11   : > { %s642_s29 = scalar_select %p25_p12, %s553_s14, %s27_s27  }
  0x12   : > { %375 = dma.hbm_to_vmem [thread:$0]  (!%p373_p11), %s132_s22, 16, %s134_s25, [#allocation6]  }
  0x13   : > { %p646_p3 = por %p106_p2, %p34_p13  ;;  %p385_p5 = scmp.lt.s32.totalorder %s557_s15, 2 }
  0x14   : > { %s147_s4 = sand.u32 1, %s553_s14   ;;  %s355_s5 = sshll.u32 %s557_s15, 3 }
  0x15   : > { %p36_p7 = por %p35_p0, %p34_p13  ;;  %s354_s6 = sshll.u32 %s147_s4, 3 }
  0x16   : > { %s155_s9 = scalar_lea.hbm %s728_s0, %s355_s5  ;;  %s151_s11 = scalar_lea.vmem [#allocation2], %s354_s6 }
  0x17   : > { %s157_s10 = sshll.u32 %s155_s9, 4  ;;  %s159_s17 = sshll.u32 %s151_s11, 4  ;;  %s158_s10 = int_to_ptr.hbm [resolvable:$true] %s157_s10  ;;  %s160_s17 = int_to_ptr.vmem [resolvable:$true] %s159_s17 }
  0x18   : > { %p656_p10 = pnand %p385_p5, %p36_p7  ;;  %s148_s21 = scalar_lea.sflag [#allocation3], %s147_s4 }
  0x19   : > { %s457_s22 = sshra.s32 %s158_s10, 4  ;;  %s464_s28 = scalar_lea.hbm %s728_s0, 16  ;;  %s458_s22 = int_to_ptr.hbm [resolvable:$true] %s457_s22 }
  0x1a   : > { %s459_s24 = scalar_lea.hbm %s458_s22, 8  ;;  %p461_p11 = pneg %p656_p10 }
  0x1b   : > { %p460_p2 = scmp.ne.s32.totalorder %s458_s22, %s459_s24  ;;  %p465_p0 = scmp.lt.s32.totalorder %s458_s22, %s728_s0 }
  0x1c   : > { %p466_p5 = scmp.lt.s32.totalorder %s464_s28, %s459_s24 }
  0x1d   : > { %p462_p12 = pnand %p461_p11, %p460_p2 }
  0x1e   : > { %p467_p7 = por %p466_p5, %p465_p0 }
  0x1f   : > { %p463_p13 = pneg %p462_p12 }
  0x21   : > { %p468_p9 = pnand %p467_p7, %p463_p13 }
  0x23   : > { %471 = shalt.err (!%p468_p9)
}
  0x24   : > { %379 = dma.hbm_to_vmem [thread:$0]  (!%p656_p10), %s158_s10, 128, %s160_s17, %s148_s21  }
  0x25   : > { %168 = sbr.rel (%p623_p8) target bundleno = 337 (0x151), region = 32  ;;  %s673_s4 = sand.u32 (!%p623_p8), 1, %s549_s13  }
  0x26   : > { %s357_s7 = sshll.u32 (!%p623_p8), %s673_s4, 3  ;;  %s171_s8 = scalar_lea.sflag (!%p623_p8), [#allocation3], %s673_s4 }
  0x27   : > { %s174_s9 = scalar_lea.vmem (!%p623_p8), [#allocation2], %s357_s7 }
  0x2a   : > { %532 = dma.done.wait (%p610_p4), %s171_s8, 128  }
  0x2b   : > { %534 = vsyncadd (%p610_p4), %s171_s8, 4294967168 }
  0x2c   : > { %536 = dma.done.wait (%p41_p1), [#allocation6], 16  }
  0x2d   : > { %538 = vsyncadd (%p41_p1), [#allocation6], 4294967280  ;;  %vm206_vm0 = vcmask 261120   ;;  %v205_v0 = vld [vmem:[%s174_s9] sm:$0xff]  ;;  %s361_s18 = sshll.u32 %s601_s16, 3  ;;  %s202_s16 = scalar_lea.vmem [#allocation7], %s357_s7 }
  0x2e   : > { %v207_v1 = vsel %vm206_vm0, %v205_v0, 0.0  ;;  %v421_v29 = vld [vmem:[#allocation5] ss:$0 sm:$0xff]  ;;  %s265_s11 = scalar_lea.hbm %s731_s3, %s361_s18  ;;  %v422_v32 = vld [vmem:[%s730_s2] ss:$0 sm:$0xff]  ;;  %s267_s21 = sshll.u32 %s202_s16, 4  ;;  %s268_s21 = int_to_ptr.vmem [resolvable:$true] %s267_s21 }
  0x2f   : > { %208 = vadd.xlane.f32.xlu0 %v207_v1  ;;  %s269_s22 = sshll.u32 %s265_s11, 4  ;;  %s255_s24 = scalar_lea.sflag [#allocation4], %s673_s4  ;;  %s270_s22 = int_to_ptr.hbm [resolvable:$true] %s269_s22 }
  0x30   : > { %s501_s25 = sshra.s32 %s270_s22, 4  ;;  %s507_s6 = scalar_lea.hbm %s731_s3, 16  ;;  %s502_s25 = int_to_ptr.hbm [resolvable:$true] %s501_s25 }
  0x31   : > { %s503_s27 = scalar_lea.hbm %s502_s25, 8  ;;  %p508_p9 = scmp.lt.s32.totalorder %s502_s25, %s731_s3 }
  0x32   : > { %p504_p1 = scmp.ne.s32.totalorder %s502_s25, %s503_s27  ;;  %p509_p10 = scmp.lt.s32.totalorder %s507_s6, %s503_s27 }
  0x34   : > { %p505_p4 = pnand %p504_p1, %p646_p3  ;;  %p510_p2 = por %p509_p10, %p508_p9 }
  0x36   : > { %p506_p8 = pneg %p505_p4 }
  0x38   : > { %p511_p11 = pnand %p510_p2, %p506_p8 }
  0xa2   : > { %v209_v2 = vpop.xlane.xlu0 %208 }
  0xa3   : > { %v210_v3 = vmul.f32 0.03125, %v209_v2 }
  0xa5   : > { %v211_v4 = vsub.f32 %v205_v0, %v210_v3 }
  0xa7   : > { %v212_v5 = vmul.f32 %v211_v4, %v211_v4 }
  0xa9   : > { %v213_v6 = vsel %vm206_vm0, %v212_v5, 0.0 }
  0xaa   : > { %214 = vadd.xlane.f32.xlu0 %v213_v6 }
 0x11d   : > { %v215_v7 = vpop.xlane.xlu0 %214 }
 0x11e   : > { %v216_v8 = vmul.f32 0.032258064, %v215_v7 }
 0x120   : > { %423 = vrsqrt.f32 %v216_v8  ;;  %vm224_vm1 = vcmp.eq.f32.partialorder %v216_v8, inf  ;;  %v227_v16 = vand.u32 2147483648, %v216_v8  ;;  %vm226_vm2 = vcmp.eq.f32.partialorder %v216_v8, 0.0 }
 0x126   : > { %v424_v9 = vpop.eup %423 }
 0x127   : > { %v218_v10 = vmul.f32 %v424_v9, %v216_v8 }
 0x129   : > { %v219_v11 = vmul.f32 %v424_v9, %v218_v10 }
 0x12b   : > { %v220_v12 = vmul.f32 0.5, %v219_v11 }
 0x12d   : > { %v221_v13 = vsub.f32 1.5, %v220_v12 }
 0x12f   : > { %v222_v14 = vmul.f32 %v424_v9, %v221_v13 }
 0x131   : > { %v223_v15 = vmul.f32 %v222_v14, %v216_v8 }
 0x133   : > { %v225_v17 = vsel %vm224_vm1, %v216_v8, %v223_v15 }
 0x134   : > { %v228_v18 = vsel %vm226_vm2, %v227_v16, %v225_v17 }
 0x135   : > { %v229_v19 = vadd.f32 1e-06, %v228_v18 }
 0x137   : > { %425 = vrcp.f32 %v229_v19  ;;  %v241_v23 = vand.u32 2147483648, %v229_v19  ;;  %v239_v25 = vand.u32 2147483647, %v229_v19  ;;  %vm235_vm4 = vweird.f32 %v229_v19 }
 0x139   : > { %v242_v27 = vor.u32 1.1754944e-38, %v241_v23  ;;  %vm240_vm6 = vcmp.eq.f32.partialorder %v239_v25, 8.507059e+37 }
 0x13d   : > { %v426_v20 = vpop.eup %425 }
 0x13e   : > { %v231_v21 = vmul.f32 %v426_v20, %v229_v19  ;;  %vm236_vm3 = vweird.f32 %v426_v20 }
 0x13f   : > { %vm237_vm5 = vmor %vm235_vm4, %vm236_vm3 }
 0x140   : > { %v232_v22 = vsub.f32 1.0, %v231_v21 }
 0x142   : > { %v233_v24 = vmul.f32 %v426_v20, %v232_v22 }
 0x144   : > { %v234_v26 = vadd.f32 %v426_v20, %v233_v24 }
 0x146   : > { %v238_v28 = vsel %vm237_vm5, %v426_v20, %v234_v26 }
 0x147   : > { %v243_v30 = vsel %vm240_vm6, %v242_v27, %v238_v28 }
 0x148   : > { %v244_v31 = vmul.f32 %v243_v30, %v211_v4 }
 0x14a   : > { %v248_v33 = vmul.f32 %v421_v29, %v244_v31 }
 0x14c   : > { %v252_v34 = vadd.f32 %v422_v32, %v248_v33 }
 0x14e   : > { %253 = vst.msk [vmem:[%s202_s16] sm:$0xff] %vm206_vm0, %v252_v34 }
 0x14f   : > { %514 = shalt.err (!%p511_p11)
}
 0x150   : > { %370 = dma.vmem_to_hbm [thread:$0]  (%p646_p3), %s268_s21, 128, %s270_s22, %s255_s24  }
 0x151 PF: > { %s281_s4 = sand.u32 1, %s545_s12   ;;  %p737_p12 = scmp.ge.s32.totalorder %s557_s15, 2 }
 0x152   : > { %s282_s9 = scalar_lea.sflag [#allocation4], %s281_s4 }
 0x153   : > { %p381_p13 = pnand %p737_p12, %p615_p6 }
 0x155   : > { %p382_p0 = pneg %p381_p13 }
 0x157   : > { %540 = dma.done.wait (%p382_p0), %s282_s9, 128  }
 0x158   : > { %542 = vsyncadd (%p382_p0), %s282_s9, 4294967168  ;;  %p17_p5 = scmp.ge.s32.totalorder %s633_s26, 4   ;;  %s738_s12 = smov %s549_s13 }
 0x159   : > { %s739_s13 = smov %s553_s14  ;;  %s740_s14 = smov %s642_s29 }
 0x15a   : > { %s741_s15 = smov %s633_s26  ;;  %19 = sbr.rel (!%p17_p5) target bundleno = 6 (0x6), region = 81 }
 0x15f   :  { %288 = vsyncpa [#allocation3], 1 }
 0x160   :  { %290 = vsyncpa [#allocation3 + $0x1], 1 }
 0x161   :  { %291 = vsyncpa [#allocation6], 1 }
 0x162   :  { %292 = vsyncpa [#allocation4], 1 }
 0x163   :  { %294 = vsyncpa [#allocation4 + $0x1], 1 }

</bundles_post_ra>
